<compile_context>
chip_gen: v5e
topology: v5e:2x2
jax: 0.10.0
libtpu: 0.0.40
codegen_flags: <defaults>
</compile_context>

<pallas_src>
import functools

import jax
import jax.numpy as jnp
import numpy as np
from jax import lax
from jax.experimental import pallas as pl
from jax.experimental.pallas import tpu as pltpu


def _selector_kernel(x_ref, g_ref, w_ref, b_ref,
                     mask_ref, gprob_ref, pprob_ref, sigma_ref,
                     acc_ref, *maybe_gcache,
                     n_seg, emb_dim, tile, cache_groups):
    gcache_ref = maybe_gcache[0] if cache_groups else None
    p = pl.program_id(1)          # 0 = accumulate phase, 1 = finalize/emit phase
    t = pl.program_id(2)          # pixel-tile index

    @pl.when(p == 0)
    def _accumulate():
        @pl.when(t == 0)
        def _init():
            acc_ref[...] = jnp.zeros_like(acc_ref)

        g = g_ref[0]                                          # (1, tile) int32
        if cache_groups:
            # Persist the group ids so phase 1 does not re-stream them from HBM.
            gcache_ref[pl.ds(t, 1), :] = g

        x = x_ref[0]                                          # (C, tile) f32
        # 1x1-conv projection on the MXU.  Phase 0's binding slot is the VALU
        # (one-hot compare below); the MXU/vex slot is otherwise idle, so low
        # utilisation at K=C is irrelevant and this frees the per-channel
        # broadcast-FMA VALU issues and relayouts.  Row `emb_dim` of
        # (w_aug, b_aug) is the constant-one feature whose group sum gives the
        # per-group pixel count.
        emb = jnp.dot(w_ref[...], x,
                      preferred_element_type=jnp.float32) + b_ref[...]  # (E+1, tile)

        # Per-pixel selection probability (channel 0), lane-dense store.
        pprob_ref[0] = jax.nn.sigmoid(emb[0:1, :])            # (1, tile)

        # One-hot group map is only needed in this phase (phase 1 uses the
        # bitset gather).  The contraction below hits the lane dim of both
        # operands so Mosaic relayouts one side via the XLU — acceptable, the
        # XLU slot is otherwise idle here (only matters once S >= 64).
        seg_iota = lax.broadcasted_iota(jnp.int32, (n_seg, tile), 0)
        onehot = (g == seg_iota).astype(jnp.float32)          # (S, tile)

        # Group sums (+ counts in the last row): single K=tile contraction.
        # Kept in f32: bf16 operands would cut MXU passes on v6e/v7x but the
        # 2e-4 tolerance on group_probs/sigma has not been re-validated.
        acc_ref[...] += lax.dot_general(
            emb, onehot, (((1,), (1,)), ((), ())),
            preferred_element_type=jnp.float32)               # (E+1, S)

    @pl.when(p == 1)
    def _emit():
        acc = acc_ref[...]
        counts = acc[emb_dim:emb_dim + 1, :]                  # (1, S)
        # scatter_reduce 'mean' with include_self=False: empty groups stay 0.
        group_avg = acc[:emb_dim, :] / jnp.maximum(counts, 1.0)   # (E, S)
        mu = group_avg[0:1, :]                                # (1, S)

        @pl.when(t == 0)
        def _finalize():
            gprob_ref[0] = jax.nn.sigmoid(mu)                 # (1, S)
            gemb = group_avg[1:, :]                           # (E-1, S)
            sigma = lax.dot_general(gemb, gemb, (((0,), (0,)), ((), ())),
                                    preferred_element_type=jnp.float32)  # (S, S)
            eye = (lax.broadcasted_iota(jnp.int32, (n_seg, n_seg), 0) ==
                   lax.broadcasted_iota(jnp.int32, (n_seg, n_seg), 1)
                   ).astype(jnp.float32)
            # TODO(synk): numerical_stability_check() source is unavailable;
            # apply a fixed diagonal jitter instead of its exact behaviour.
            sigma_ref[0] = sigma + 1e-6 * eye

        # hard = (sigmoid(mu) > 0.5)  <=>  (mu > 0)  (differs only at exact
        # ties).  Pack `hard` into ceil(S/32) int32 bit-words, then expand to
        # pixels with a per-lane bit test: ~3 VPU ops/pixel independent of S,
        # versus ~3*S VPU ops/pixel for a one-hot + (1,S)x(S,tile) matmul.
        hard_bits = (mu > 0.0).astype(jnp.int32)              # (1, S)
        s_idx = lax.broadcasted_iota(jnp.int32, (1, n_seg), 1)
        contrib = lax.shift_left(hard_bits, s_idx & 31)       # disjoint bits

        if cache_groups:
            g = gcache_ref[pl.ds(t, 1), :]                    # (1, tile) from VMEM
        else:
            g = g_ref[0]                                      # streamed again

        n_words = (n_seg + 31) // 32
        if n_words == 1:
            word = jnp.sum(contrib, axis=1, keepdims=True)    # (1, 1) bitset
            word_pix = jnp.broadcast_to(word, (1, tile))
        else:
            word_id = s_idx >> 5                              # (1, S)
            g_word = g >> 5                                   # (1, tile)
            word_pix = jnp.zeros((1, tile), jnp.int32)
            for w in range(n_words):                          # static, small
                ww = jnp.sum(jnp.where(word_id == w, contrib, 0),
                             axis=1, keepdims=True)           # (1, 1)
                word_pix = jnp.where(g_word == w,
                                     jnp.broadcast_to(ww, (1, tile)), word_pix)

        bit = lax.shift_right_logical(word_pix, g & 31) & 1   # (1, tile)
        mask_ref[0] = bit.astype(jnp.float32)                 # lane-dense store


_TILE_CANDIDATES = (16384, 8192, 4096, 2048, 1024, 512)
_VMEM_BUDGET = 24 << 20           # stay below the 32 MiB scoped-VMEM default
_VMEM_BUDGET_WITH_CACHE = 28 << 20


def _vmem_estimate(tile, C, E, S):
    """Rough per-step VMEM footprint (bytes): pipelined blocks + big temps."""
    f = 4
    stream = 2 * (C + 3) * tile * f       # double-buffered x+g in, mask+pprob out
    temps = (2 * S + E + 3) * tile * f    # (S,tile) one-hot (+XLU relayout), emb
    return stream + temps + (E + 1) * S * f


def _g_cache_bytes(n_tiles, tile):
    return ((n_tiles + 7) // 8) * 8 * tile * 4   # int32, sublane-padded to 8


def selector_forward(x, groups, w, b, *, n_segments, num_monte_carlo,
                     tile_hw=None, cache_groups=None):
    """Validation-mode Selector.forward.

    x:      (B, C, H, W) f32   NCHW like PyTorch
    groups: (B, H, W)    int32 superpixel ids in [0, n_segments)
    w:      (E, C)       1x1-conv weight of the importance predictor
    b:      (E,)         conv bias
    Returns (mask, group_probs, pixel_probs, groups_cov) with shapes
    (B, C, H, W, M), (B, S), (B, H, W), (B, S, S).
    """
    B, C, H, W = x.shape
    HW = H * W
    E = w.shape[0]
    S = int(n_segments)
    M = int(num_monte_carlo)

    if tile_hw is None:
        # Largest preferred candidate that divides HW and fits the VMEM budget
        # (big tiles amortize the ~0.35 us grid-step overhead and lengthen DMA
        # bursts; the budget keeps v7x's 64 MiB VMEM / 32 MiB scoped default
        # safe even when n_segments grows).
        for cand in _TILE_CANDIDATES:
            if HW % cand == 0 and _vmem_estimate(cand, C, E, S) <= _VMEM_BUDGET:
                tile_hw = cand
                break
        else:
            # Small / oddly-shaped images: one full-extent tile.
            # TODO(synk): a padded path (masking the constant-one counts row)
            # is needed for HW not divisible by 128 that is also too large
            # for a single tile.
            tile_hw = HW
    assert HW % tile_hw == 0, "tile_hw must divide H*W"
    T = HW // tile_hw

    if cache_groups is None:
        cache_groups = (_vmem_estimate(tile_hw, C, E, S) +
                        _g_cache_bytes(T, tile_hw)) <= _VMEM_BUDGET_WITH_CACHE

    # NCHW already has HW contiguous last -> no transpose needed.
    x_flat = x.reshape(B, C, HW).astype(jnp.float32)
    g_flat = groups.reshape(B, 1, HW).astype(jnp.int32)

    # Fold bias and the counts feature into the projection:
    #   w_aug rows 0..E-1 = w, row E = 0 ; b_aug rows 0..E-1 = b, row E = 1
    # so emb_aug = w_aug @ x + b_aug has the original E channels plus a
    # constant-one row whose group sum is the per-group pixel count.
    w_aug = jnp.concatenate(
        [jnp.asarray(w, jnp.float32), jnp.zeros((1, C), jnp.float32)], axis=0)
    b_aug = jnp.concatenate(
        [jnp.asarray(b, jnp.float32), jnp.ones((1,), jnp.float32)],
        axis=0).reshape(E + 1, 1)

    kernel = functools.partial(_selector_kernel, n_seg=S, emb_dim=E,
                               tile=tile_hw, cache_groups=cache_groups)

    out_shape = (
        jax.ShapeDtypeStruct((B, 1, HW), jnp.float32),   # per-pixel mask row
        jax.ShapeDtypeStruct((B, 1, S), jnp.float32),    # group probs
        jax.ShapeDtypeStruct((B, 1, HW), jnp.float32),   # pixel probs
        jax.ShapeDtypeStruct((B, S, S), jnp.float32),    # group covariance
    )

    # Index-map pinning: blocks unused in a phase keep their previous index so
    # they are neither re-DMA'd nor written back with stale data.
    x_map = lambda b_, p_, t_: (b_, 0, jnp.where(p_ == 0, t_, T - 1))
    if cache_groups:
        g_map = lambda b_, p_, t_: (b_, 0, jnp.where(p_ == 0, t_, T - 1))
    else:
        g_map = lambda b_, p_, t_: (b_, 0, t_)
    const_map = lambda b_, p_, t_: (0, 0)
    mask_map = lambda b_, p_, t_: (b_, 0, jnp.where(p_ == 1, t_, 0))
    pprob_map = lambda b_, p_, t_: (b_, 0, jnp.where(p_ == 0, t_, T - 1))
    small_map = lambda b_, p_, t_: (b_, 0, 0)

    scratch_shapes = [pltpu.VMEM((E + 1, S), jnp.float32)]      # [sums ; counts]
    if cache_groups:
        scratch_shapes.append(pltpu.VMEM((T, tile_hw), jnp.int32))  # group-id cache

    est = _vmem_estimate(tile_hw, C, E, S) + \
        (_g_cache_bytes(T, tile_hw) if cache_groups else 0)
    vmem_limit = None if est <= (28 << 20) else min(64 << 20, (est * 3) // 2)

    mask_row, gprobs, pprobs, sigma = pl.pallas_call(
        kernel,
        grid=(B, 2, T),
        in_specs=[
            pl.BlockSpec((1, C, tile_hw), x_map),
            pl.BlockSpec((1, 1, tile_hw), g_map),
            pl.BlockSpec((E + 1, C), const_map),
            pl.BlockSpec((E + 1, 1), const_map),
        ],
        out_specs=(
            pl.BlockSpec((1, 1, tile_hw), mask_map),
            pl.BlockSpec((1, 1, S), small_map),
            pl.BlockSpec((1, 1, tile_hw), pprob_map),
            pl.BlockSpec((1, S, S), small_map),
        ),
        out_shape=out_shape,
        scratch_shapes=scratch_shapes,
        compiler_params=pltpu.CompilerParams(
            dimension_semantics=("parallel", "arbitrary", "arbitrary"),
            vmem_limit_bytes=vmem_limit),
    )(x_flat, g_flat, w_aug, b_aug)

    group_probs = gprobs.reshape(B, S)
    pixel_probs = pprobs.reshape(B, H, W)
    # Validation-mode MC samples are identical and the C axis is a pure repeat:
    # broadcast at the boundary (layout-only; under jit the consumer can fuse
    # or elide it instead of materializing B*C*H*W*M in HBM).
    mask = jnp.broadcast_to(mask_row.reshape(B, 1, H, W, 1), (B, C, H, W, M))
    return mask, group_probs, pixel_probs, sigma


def selector_reference(x, groups, w, b, *, n_segments, num_monte_carlo):
    """Pure-JAX reference mirroring the PyTorch validation path."""
    B, C, H, W = x.shape
    E = w.shape[0]
    S = int(n_segments)
    M = int(num_monte_carlo)
    hp = jax.lax.Precision.HIGHEST

    emb = jnp.einsum('bchw,ec->behw', x, w, precision=hp) + b[None, :, None, None]
    pixel_probs = jax.nn.sigmoid(emb[:, 0])                        # (B, H, W)

    gf = groups.reshape(B, -1)                                     # (B, HW)
    ef = emb.reshape(B, E, -1)                                     # (B, E, HW)
    onehot = (gf[:, :, None] == jnp.arange(S)[None, None, :]).astype(jnp.float32)
    sums = jnp.einsum('bep,bps->bes', ef, onehot, precision=hp)    # (B, E, S)
    counts = onehot.sum(axis=1)                                    # (B, S)
    group_avg = sums / jnp.maximum(counts, 1.0)[:, None, :]        # (B, E, S)

    mu = group_avg[:, 0]                                           # (B, S)
    group_probs = jax.nn.sigmoid(mu)
    gemb = group_avg[:, 1:]                                        # (B, E-1, S)
    sigma = jnp.einsum('bes,bet->bst', gemb, gemb, precision=hp) + 1e-6 * jnp.eye(S)

    hard = (group_probs > 0.5).astype(jnp.float32)                 # (B, S)
    mask_pix = jnp.take_along_axis(hard, gf, axis=1)               # (B, HW)
    mask = jnp.broadcast_to(mask_pix.reshape(B, 1, H, W, 1), (B, C, H, W, M))
    return mask, group_probs, pixel_probs, sigma


if __name__ == "__main__":
    key = jax.random.PRNGKey(0)
    names = ("mask", "group_probs", "pixel_probs", "groups_cov")

    configs = [
        # (B, C, H, W, E, S, M)
        (2, 4, 16, 16, 8, 16, 8),    # S <= 32: single-word bitset path
        (1, 4, 32, 32, 8, 40, 4),    # S > 32: multi-word bitset path
    ]
    for (B, C, H, W, E, S, M) in configs:
        k1, k2, k3, k4 = jax.random.split(jax.random.fold_in(key, S), 4)
        x = jax.random.normal(k1, (B, C, H, W), jnp.float32)
        groups = jax.random.randint(k2, (B, H, W), 0, S, jnp.int32)
        w = 0.3 * jax.random.normal(k3, (E, C), jnp.float32)   # 1x1-conv weight (out, in)
        b = 0.1 * jax.random.normal(k4, (E,), jnp.float32)

        refs = selector_reference(x, groups, w, b, n_segments=S, num_monte_carlo=M)

        # tile_hw=128 forces multiple pixel tiles (exercises the accumulate /
        # emit phases and both the cached-g and streamed-g variants); None
        # lets the wrapper auto-pick the largest tile that fits the budget.
        for tile, cache in ((128, True), (128, False), (None, None)):
            outs = jax.block_until_ready(
                selector_forward(x, groups, w, b, n_segments=S,
                                 num_monte_carlo=M, tile_hw=tile,
                                 cache_groups=cache))
            for name, o, r in zip(names, outs, refs):
                np.testing.assert_allclose(
                    np.asarray(o), np.asarray(r), atol=2e-4, rtol=2e-4,
                    err_msg=f"{name} (S={S}, tile={tile}, cache={cache})")

    print("KERNEL_OK")
</pallas_src>

<mosaic_0001>
module attributes {stable_mosaic.version = 11 : i64} {
  func.func @_selector_kernel(%arg0: i32, %arg1: i32, %arg2: i32, %arg3: memref<1x4x128xf32, #tpu.memory_space<vmem>>, %arg4: memref<1x1x128xi32, #tpu.memory_space<vmem>>, %arg5: memref<9x4xf32, #tpu.memory_space<vmem>>, %arg6: memref<9x1xf32, #tpu.memory_space<vmem>>, %arg7: memref<1x1x128xf32, #tpu.memory_space<vmem>>, %arg8: memref<1x1x16xf32, #tpu.memory_space<vmem>>, %arg9: memref<1x1x128xf32, #tpu.memory_space<vmem>>, %arg10: memref<1x16x16xf32, #tpu.memory_space<vmem>>, %arg11: memref<9x16xf32, #tpu.memory_space<vmem>>, %arg12: memref<2x128xi32, #tpu.memory_space<vmem>>) attributes {dimension_semantics = [#tpu.dimension_semantics<parallel>, #tpu.dimension_semantics<arbitrary>, #tpu.dimension_semantics<arbitrary>], iteration_bounds = array<i64: 2, 2, 2>, scalar_prefetch = 0 : i64, scratch_operands = 2 : i64, tpu.core_type = #tpu.core_type<tc>, window_params = [{transform_indices = @transform_0, window_bounds = array<i64: 1, 4, 128>}, {transform_indices = @transform_1, window_bounds = array<i64: 1, 1, 128>}, {pipeline_mode = #tpu.pipeline_mode<synchronous>, transform_indices = @transform_2, window_bounds = array<i64: 9, 4>}, {pipeline_mode = #tpu.pipeline_mode<synchronous>, transform_indices = @transform_3, window_bounds = array<i64: 9, 1>}, {transform_indices = @transform_4, window_bounds = array<i64: 1, 1, 128>}, {transform_indices = @transform_5, window_bounds = array<i64: 1, 1, 16>}, {transform_indices = @transform_6, window_bounds = array<i64: 1, 1, 128>}, {transform_indices = @transform_7, window_bounds = array<i64: 1, 16, 16>}]} {
    %c0_i32 = arith.constant 0 : i32
    %0 = arith.cmpi eq, %arg1, %c0_i32 : i32
    %1 = arith.extui %0 : i1 to i32
    %c0_i32_0 = arith.constant 0 : i32
    %2 = arith.cmpi ne, %1, %c0_i32_0 : i32
    scf.if %2 {
      %c0_i32_2 = arith.constant 0 : i32
      %6 = arith.cmpi eq, %arg2, %c0_i32_2 : i32
      %7 = arith.extui %6 : i1 to i32
      %c0_i32_3 = arith.constant 0 : i32
      %8 = arith.cmpi ne, %7, %c0_i32_3 : i32
      scf.if %8 {
        %cst_23 = arith.constant 0.000000e+00 : f32
        %38 = vector.broadcast %cst_23 : f32 to vector<9x16xf32>
        %c0_24 = arith.constant 0 : index
        %c0_25 = arith.constant 0 : index
        %39 = vector.load %arg11[%c0_24, %c0_25] : memref<9x16xf32, #tpu.memory_space<vmem>>, vector<9x16xf32>
        tpu.vector_store %arg11[%c0_24, %c0_25], %38 {strides = array<i32>} : memref<9x16xf32, #tpu.memory_space<vmem>>, vector<9x16xf32>,
      } else {
      }
      %c0 = arith.constant 0 : index
      %c0_4 = arith.constant 0 : index
      %c0_5 = arith.constant 0 : index
      %9 = vector.load %arg4[%c0, %c0_4, %c0_5] : memref<1x1x128xi32, #tpu.memory_space<vmem>>, vector<1x1x128xi32>
      %10 = vector.shape_cast %9 : vector<1x1x128xi32> to vector<1x128xi32>
      %11 = arith.index_cast %arg2 : i32 to index
      %c0_6 = arith.constant 0 : index
      %12 = vector.load %arg12[%11, %c0_6] : memref<2x128xi32, #tpu.memory_space<vmem>>, vector<1x128xi32>
      tpu.vector_store %arg12[%11, %c0_6], %10 {strides = array<i32>} : memref<2x128xi32, #tpu.memory_space<vmem>>, vector<1x128xi32>,
      %c0_7 = arith.constant 0 : index
      %c0_8 = arith.constant 0 : index
      %c0_9 = arith.constant 0 : index
      %13 = vector.load %arg3[%c0_7, %c0_8, %c0_9] : memref<1x4x128xf32, #tpu.memory_space<vmem>>, vector<1x4x128xf32>
      %14 = vector.shape_cast %13 : vector<1x4x128xf32> to vector<4x128xf32>
      %c0_10 = arith.constant 0 : index
      %c0_11 = arith.constant 0 : index
      %15 = vector.load %arg5[%c0_10, %c0_11] : memref<9x4xf32, #tpu.memory_space<vmem>>, vector<9x4xf32>
      %cst = arith.constant dense<0.000000e+00> : vector<9x128xf32>
      %16 = tpu.matmul %15, %14, %cst {dimension_numbers = #tpu.dot_dimension_numbers<[1], [0], [0], [1], [0, 0, 1, 1], [], []>} : vector<9x4xf32>, vector<4x128xf32>, vector<9x128xf32> -> vector<9x128xf32>
      %c0_12 = arith.constant 0 : index
      %c0_13 = arith.constant 0 : index
      %17 = vector.load %arg6[%c0_12, %c0_13] : memref<9x1xf32, #tpu.memory_space<vmem>>, vector<9x1xf32>
      %18 = vector.broadcast %17 : vector<9x1xf32> to vector<9x128xf32>
      %19 = arith.addf %16, %18 : vector<9x128xf32>
      %20 = vector.extract_strided_slice %19 {offsets = [0, 0], sizes = [1, 128], strides = [1, 1]} : vector<9x128xf32> to vector<1x128xf32>
      %21 = arith.negf %20 : vector<1x128xf32>
      %22 = math.exp %21 : vector<1x128xf32>
      %cst_14 = arith.constant 1.000000e+00 : f32
      %23 = vector.broadcast %cst_14 : f32 to vector<1x128xf32>
      %24 = arith.addf %23, %22 : vector<1x128xf32>
      %25 = arith.divf %23, %24 : vector<1x128xf32>
      %c0_15 = arith.constant 0 : index
      %c0_16 = arith.constant 0 : index
      %c0_17 = arith.constant 0 : index
      %26 = vector.load %arg9[%c0_15, %c0_16, %c0_17] : memref<1x1x128xf32, #tpu.memory_space<vmem>>, vector<1x1x128xf32>
      %27 = vector.shape_cast %26 : vector<1x1x128xf32> to vector<1x128xf32>
      %28 = vector.shape_cast %25 : vector<1x128xf32> to vector<1x1x128xf32>
      tpu.vector_store %arg9[%c0_15, %c0_16, %c0_17], %28 {strides = array<i32>} : memref<1x1x128xf32, #tpu.memory_space<vmem>>, vector<1x1x128xf32>,
      %29 = tpu.iota {dimensions = array<i32: 0>} : vector<16x128xi32>
      %30 = vector.broadcast %10 : vector<1x128xi32> to vector<16x128xi32>
      %31 = arith.cmpi eq, %30, %29 : vector<16x128xi32>
      %32 = arith.extui %31 : vector<16x128xi1> to vector<16x128xi32>
      %33 = arith.sitofp %32 : vector<16x128xi32> to vector<16x128xf32>
      %c0_18 = arith.constant 0 : index
      %c0_19 = arith.constant 0 : index
      %34 = vector.load %arg11[%c0_18, %c0_19] : memref<9x16xf32, #tpu.memory_space<vmem>>, vector<9x16xf32>
      %cst_20 = arith.constant dense<0.000000e+00> : vector<9x16xf32>
      %35 = tpu.matmul %19, %33, %cst_20 {dimension_numbers = #tpu.dot_dimension_numbers<[1], [1], [0], [0], [0, 0, 1, 0], [], []>} : vector<9x128xf32>, vector<16x128xf32>, vector<9x16xf32> -> vector<9x16xf32>
      %36 = arith.addf %34, %35 : vector<9x16xf32>
      %c0_21 = arith.constant 0 : index
      %c0_22 = arith.constant 0 : index
      %37 = vector.load %arg11[%c0_21, %c0_22] : memref<9x16xf32, #tpu.memory_space<vmem>>, vector<9x16xf32>
      tpu.vector_store %arg11[%c0_21, %c0_22], %36 {strides = array<i32>} : memref<9x16xf32, #tpu.memory_space<vmem>>, vector<9x16xf32>,
    } else {
    }
    %c1_i32 = arith.constant 1 : i32
    %3 = arith.cmpi eq, %arg1, %c1_i32 : i32
    %4 = arith.extui %3 : i1 to i32
    %c0_i32_1 = arith.constant 0 : i32
    %5 = arith.cmpi ne, %4, %c0_i32_1 : i32
    scf.if %5 {
      %c0 = arith.constant 0 : index
      %c0_2 = arith.constant 0 : index
      %6 = vector.load %arg11[%c0, %c0_2] : memref<9x16xf32, #tpu.memory_space<vmem>>, vector<9x16xf32>
      %7 = vector.extract_strided_slice %6 {offsets = [8, 0], sizes = [1, 16], strides = [1, 1]} : vector<9x16xf32> to vector<1x16xf32>
      %8 = vector.extract_strided_slice %6 {offsets = [0, 0], sizes = [8, 16], strides = [1, 1]} : vector<9x16xf32> to vector<8x16xf32>
      %cst = arith.constant 1.000000e+00 : f32
      %9 = vector.broadcast %cst : f32 to vector<1x16xf32>
      %10 = arith.maximumf %7, %9 : vector<1x16xf32>
      %11 = vector.broadcast %10 : vector<1x16xf32> to vector<8x16xf32>
      %12 = arith.divf %8, %11 : vector<8x16xf32>
      %13 = vector.extract_strided_slice %12 {offsets = [0, 0], sizes = [1, 16], strides = [1, 1]} : vector<8x16xf32> to vector<1x16xf32>
      %c0_i32_3 = arith.constant 0 : i32
      %14 = arith.cmpi eq, %arg2, %c0_i32_3 : i32
      %15 = arith.extui %14 : i1 to i32
      %c0_i32_4 = arith.constant 0 : i32
      %16 = arith.cmpi ne, %15, %c0_i32_4 : i32
      scf.if %16 {
        %39 = arith.negf %13 : vector<1x16xf32>
        %40 = math.exp %39 : vector<1x16xf32>
        %cst_13 = arith.constant 1.000000e+00 : f32
        %41 = vector.broadcast %cst_13 : f32 to vector<1x16xf32>
        %42 = arith.addf %41, %40 : vector<1x16xf32>
        %43 = arith.divf %41, %42 : vector<1x16xf32>
        %c0_14 = arith.constant 0 : index
        %c0_15 = arith.constant 0 : index
        %c0_16 = arith.constant 0 : index
        %44 = vector.load %arg8[%c0_14, %c0_15, %c0_16] : memref<1x1x16xf32, #tpu.memory_space<vmem>>, vector<1x1x16xf32>
        %45 = vector.shape_cast %44 : vector<1x1x16xf32> to vector<1x16xf32>
        %46 = vector.shape_cast %43 : vector<1x16xf32> to vector<1x1x16xf32>
        tpu.vector_store %arg8[%c0_14, %c0_15, %c0_16], %46 {strides = array<i32>} : memref<1x1x16xf32, #tpu.memory_space<vmem>>, vector<1x1x16xf32>,
        %47 = vector.extract_strided_slice %12 {offsets = [1, 0], sizes = [7, 16], strides = [1, 1]} : vector<8x16xf32> to vector<7x16xf32>
        %cst_17 = arith.constant dense<0.000000e+00> : vector<16x16xf32>
        %48 = tpu.matmul %47, %47, %cst_17 {dimension_numbers = #tpu.dot_dimension_numbers<[0], [0], [1], [1], [0, 1, 1, 1], [], []>} : vector<7x16xf32>, vector<7x16xf32>, vector<16x16xf32> -> vector<16x16xf32>
        %49 = tpu.iota {dimensions = array<i32: 0>} : vector<16x16xi32>
        %50 = tpu.iota {dimensions = array<i32: 1>} : vector<16x16xi32>
        %51 = arith.cmpi eq, %49, %50 : vector<16x16xi32>
        %52 = arith.extui %51 : vector<16x16xi1> to vector<16x16xi32>
        %53 = arith.sitofp %52 : vector<16x16xi32> to vector<16x16xf32>
        %cst_18 = arith.constant 9.99999997E-7 : f32
        %54 = vector.broadcast %cst_18 : f32 to vector<16x16xf32>
        %55 = arith.mulf %54, %53 : vector<16x16xf32>
        %56 = arith.addf %48, %55 : vector<16x16xf32>
        %c0_19 = arith.constant 0 : index
        %c0_20 = arith.constant 0 : index
        %c0_21 = arith.constant 0 : index
        %57 = vector.load %arg10[%c0_19, %c0_20, %c0_21] : memref<1x16x16xf32, #tpu.memory_space<vmem>>, vector<1x16x16xf32>
        %58 = vector.shape_cast %57 : vector<1x16x16xf32> to vector<16x16xf32>
        %59 = vector.shape_cast %56 : vector<16x16xf32> to vector<1x16x16xf32>
        tpu.vector_store %arg10[%c0_19, %c0_20, %c0_21], %59 {strides = array<i32>} : memref<1x16x16xf32, #tpu.memory_space<vmem>>, vector<1x16x16xf32>,
      } else {
      }
      %cst_5 = arith.constant 0.000000e+00 : f32
      %17 = vector.broadcast %cst_5 : f32 to vector<1x16xf32>
      %18 = arith.cmpf ogt, %13, %17 : vector<1x16xf32>
      %19 = arith.extui %18 : vector<1x16xi1> to vector<1x16xi32>
      %20 = tpu.iota {dimensions = array<i32: 1>} : vector<1x16xi32>
      %c31_i32 = arith.constant 31 : i32
      %21 = vector.broadcast %c31_i32 : i32 to vector<1x16xi32>
      %22 = arith.andi %20, %21 : vector<1x16xi32>
      %23 = arith.shli %19, %22 : vector<1x16xi32>
      %24 = arith.index_cast %arg2 : i32 to index
      %c0_6 = arith.constant 0 : index
      %25 = vector.load %arg12[%24, %c0_6] : memref<2x128xi32, #tpu.memory_space<vmem>>, vector<1x128xi32>
      %cst_7 = arith.constant dense<0> : vector<1xi32>
      %26 = vector.multi_reduction <add>, %23, %cst_7 [1] : vector<1x16xi32> to vector<1xi32>
      %27 = vector.shape_cast %26 : vector<1xi32> to vector<1x1xi32>
      %28 = vector.shape_cast %27 : vector<1x1xi32> to vector<1x1xi32>
      %29 = vector.broadcast %28 : vector<1x1xi32> to vector<1x128xi32>
      %c31_i32_8 = arith.constant 31 : i32
      %30 = vector.broadcast %c31_i32_8 : i32 to vector<1x128xi32>
      %31 = arith.andi %25, %30 : vector<1x128xi32>
      %32 = arith.shrui %29, %31 : vector<1x128xi32>
      %c1_i32_9 = arith.constant 1 : i32
      %33 = vector.broadcast %c1_i32_9 : i32 to vector<1x128xi32>
      %34 = arith.andi %32, %33 : vector<1x128xi32>
      %35 = arith.sitofp %34 : vector<1x128xi32> to vector<1x128xf32>
      %c0_10 = arith.constant 0 : index
      %c0_11 = arith.constant 0 : index
      %c0_12 = arith.constant 0 : index
      %36 = vector.load %arg7[%c0_10, %c0_11, %c0_12] : memref<1x1x128xf32, #tpu.memory_space<vmem>>, vector<1x1x128xf32>
      %37 = vector.shape_cast %36 : vector<1x1x128xf32> to vector<1x128xf32>
      %38 = vector.shape_cast %35 : vector<1x128xf32> to vector<1x1x128xf32>
      tpu.vector_store %arg7[%c0_10, %c0_11, %c0_12], %38 {strides = array<i32>} : memref<1x1x128xf32, #tpu.memory_space<vmem>>, vector<1x1x128xf32>,
    } else {
    }
    return
  }
  func.func @transform_0(%arg0: i32, %arg1: i32, %arg2: i32) -> (i32, i32, i32) {
    %c0_i32 = arith.constant 0 : i32
    %0 = arith.cmpi eq, %arg1, %c0_i32 : i32
    %c1_i32 = arith.constant 1 : i32
    %1 = arith.select %0, %arg2, %c1_i32 : i32
    %c0_i32_0 = arith.constant 0 : i32
    %c0_i32_1 = arith.constant 0 : i32
    return %arg0, %c0_i32_0, %1 : i32, i32, i32
  }
  func.func @transform_1(%arg0: i32, %arg1: i32, %arg2: i32) -> (i32, i32, i32) {
    %c0_i32 = arith.constant 0 : i32
    %0 = arith.cmpi eq, %arg1, %c0_i32 : i32
    %c1_i32 = arith.constant 1 : i32
    %1 = arith.select %0, %arg2, %c1_i32 : i32
    %c0_i32_0 = arith.constant 0 : i32
    %c0_i32_1 = arith.constant 0 : i32
    return %arg0, %c0_i32_0, %1 : i32, i32, i32
  }
  func.func @transform_2(%arg0: i32, %arg1: i32, %arg2: i32) -> (i32, i32) {
    %c0_i32 = arith.constant 0 : i32
    %c0_i32_0 = arith.constant 0 : i32
    %c0_i32_1 = arith.constant 0 : i32
    return %c0_i32, %c0_i32_0 : i32, i32
  }
  func.func @transform_3(%arg0: i32, %arg1: i32, %arg2: i32) -> (i32, i32) {
    %c0_i32 = arith.constant 0 : i32
    %c0_i32_0 = arith.constant 0 : i32
    %c0_i32_1 = arith.constant 0 : i32
    return %c0_i32, %c0_i32_0 : i32, i32
  }
  func.func @transform_4(%arg0: i32, %arg1: i32, %arg2: i32) -> (i32, i32, i32) {
    %c1_i32 = arith.constant 1 : i32
    %0 = arith.cmpi eq, %arg1, %c1_i32 : i32
    %c0_i32 = arith.constant 0 : i32
    %1 = arith.select %0, %arg2, %c0_i32 : i32
    %c0_i32_0 = arith.constant 0 : i32
    %c0_i32_1 = arith.constant 0 : i32
    return %arg0, %c0_i32_0, %1 : i32, i32, i32
  }
  func.func @transform_5(%arg0: i32, %arg1: i32, %arg2: i32) -> (i32, i32, i32) {
    %c0_i32 = arith.constant 0 : i32
    %c0_i32_0 = arith.constant 0 : i32
    %c0_i32_1 = arith.constant 0 : i32
    return %arg0, %c0_i32, %c0_i32_0 : i32, i32, i32
  }
  func.func @transform_6(%arg0: i32, %arg1: i32, %arg2: i32) -> (i32, i32, i32) {
    %c0_i32 = arith.constant 0 : i32
    %0 = arith.cmpi eq, %arg1, %c0_i32 : i32
    %c1_i32 = arith.constant 1 : i32
    %1 = arith.select %0, %arg2, %c1_i32 : i32
    %c0_i32_0 = arith.constant 0 : i32
    %c0_i32_1 = arith.constant 0 : i32
    return %arg0, %c0_i32_0, %1 : i32, i32, i32
  }
  func.func @transform_7(%arg0: i32, %arg1: i32, %arg2: i32) -> (i32, i32, i32) {
    %c0_i32 = arith.constant 0 : i32
    %c0_i32_0 = arith.constant 0 : i32
    %c0_i32_1 = arith.constant 0 : i32
    return %arg0, %c0_i32, %c0_i32_0 : i32, i32, i32
  }
}

</mosaic_0001>

<bundles_post_ra>
// kernel: tpu_custom_call.1
= control target key start
LH: loop header
LB: loop body
LE: loop exit
PB: predicated region body
PF: predicated region fallthrough
CT: control target
= control target key end

     0   :  { %s1847_s0 = inlined_call_operand.vmem [shape: f32[2,4,256], index: 0, kind: input, shape index: {}]   ;;  %s1848_s1 = inlined_call_operand.vmem [shape: s32[2,1,256], index: 1, kind: input, shape index: {}]   ;;  %s1849_s2 = inlined_call_operand.vmem [shape: f32[9,4], index: 2, kind: input, shape index: {}]   ;;  %s1850_s3 = inlined_call_operand.vmem [shape: f32[9,1], index: 3, kind: input, shape index: {}]   ;;  %s1851_s4 = inlined_call_operand.hbm [shape: f32[2,1,256], index: 4, kind: output, shape index: {0}]   ;;  %s1852_s5 = inlined_call_operand.hbm [shape: f32[2,1,16], index: 5, kind: output, shape index: {1}]   ;;  %s1853_s6 = inlined_call_operand.hbm [shape: f32[2,1,256], index: 6, kind: output, shape index: {2}]   ;;  %s1854_s7 = inlined_call_operand.hbm [shape: f32[2,16,16], index: 7, kind: output, shape index: {3}]  }
   0x1   :  { %1881 = sst [smem:[#allocation35_spill]] %s1847_s0 }
   0x2   :  { %1882 = sst [smem:[#allocation36_spill]] %s1848_s1 }
   0x3   :  { %1883 = sst [smem:[#allocation37_spill]] %s1849_s2 }
   0x4   :  { %1884 = sst [smem:[#allocation38_spill]] %s1850_s3 }
   0x5   :  { %1885 = sst [smem:[#allocation39_spill]] %s1851_s4 }
   0x6   :  { %1886 = sst [smem:[#allocation40_spill]] %s1852_s5 }
   0x7   :  { %1887 = sst [smem:[#allocation41_spill]] %s1853_s6 }
   0x8   :  { %1888 = sst [smem:[#allocation42_spill]] %s1854_s7 }
   0x9   :  { %13 = vsyncpa [#allocation5], 0 }
   0xa   :  { %15 = vsyncpa [#allocation5 + $0x1], 0 }
   0xb   :  { %16 = vsyncpa [#allocation7], 0 }
   0xc   :  { %18 = vsyncpa [#allocation7 + $0x1], 0 }
   0xd   :  { %19 = vsyncpa [#allocation10], 0 }
   0xe   :  { %21 = vsyncpa [#allocation10 + $0x1], 0  ;;  %s1461_s24 = smov 0   ;;  %s1463_s25 = smov 0  }
   0xf   :  { %s1465_s26 = smov 0   ;;  %s1467_s27 = smov 0  }
  0x10   :  { %s1469_s28 = smov 0   ;;  %s1471_s29 = smov 0  }
  0x11   :  { %s1473_s30 = smov 0   ;;  %s1475_s8 = smov 0  }
  0x12   :  { %s1477_s9 = smov 0   ;;  %s1479_s10 = smov 0  }
  0x13   :  { %s1481_s11 = smov 0   ;;  %s1483_s12 = smov 0  }
  0x14   :  { %s1485_s13 = smov 0   ;;  %s1487_s14 = smov 0  }
  0x15   :  { %s1489_s15 = smov 0   ;;  %s1491_s16 = smov 0  }
  0x16 LB: > { %1889 = sst [smem:[#allocation15_spill]] %s1356_s25  ;;  %s1856_s17 = sadd.s32 4294967295, %s1412_s16   ;;  %s1412_s16 = sphi %s1491_s16, %s27_s16   ;;  %s1408_s15 = sphi %s1489_s15, %s1957_s15   ;;  %s1404_s14 = sphi %s1487_s14, %s1953_s14   ;;  %s1400_s13 = sphi %s1485_s13, %s1952_s13   ;;  %s1396_s12 = sphi %s1483_s12, %s1951_s12   ;;  %s1392_s11 = sphi %s1481_s11, %s1950_s11   ;;  %s1388_s10 = sphi %s1479_s10, %s1949_s10   ;;  %s1384_s9 = sphi %s1477_s9, %s1948_s9   ;;  %s1380_s8 = sphi %s1475_s8, %s1956_s8   ;;  %s1376_s30 = sphi %s1473_s30, %s1955_s30   ;;  %s1372_s29 = sphi %s1471_s29, %s1946_s29   ;;  %s1368_s28 = sphi %s1469_s28, %s1945_s28   ;;  %s1364_s27 = sphi %s1467_s27, %s1944_s27   ;;  %s1360_s26 = sphi %s1465_s26, %s1943_s26   ;;  %s1356_s25 = sphi %s1463_s25, %s1942_s25   ;;  %s1352_s24 = sphi %s1461_s24, %s1941_s24  }
  0x17   : > { %1890 = sst [smem:[#allocation16_spill]] %s1360_s26  ;;  %s39_s19 = sadd.s32 1, %s1400_s13 }
  0x18   : > { %1891 = sst [smem:[#allocation17_spill]] %s1364_s27  ;;  %s42_s20 = sadd.s32 1, %s1404_s14 }
  0x19   : > { %1892 = sst [smem:[#allocation18_spill]] %s1368_s28  ;;  %p40_p0 = scmp.ge.s32.totalorder %s39_s19, 2 }
  0x1a   : > { %1893 = sst [smem:[#allocation19_spill]] %s1372_s29  ;;  %s46_s21 = sadd.s32 1, %s1408_s15 }
  0x1b   : > { %1894 = sst [smem:[#allocation20_spill]] %s1376_s30  ;;  %p156_p1 = scmp.eq.s32.totalorder %s1404_s14, 1 }
  0x1c   : > { %1895 = sst [smem:[#allocation21_spill]] %s1384_s9  ;;  %s165_s22 = sadd.s32 1, %s1384_s9 }
  0x1d   : > { %1896 = sst [smem:[#allocation22_spill]] %s1400_s13  ;;  %s1959_s19 = smov (%p40_p0, %s39_s19), 0 }
  0x1e   : > { %1897 = sst [smem:[#allocation23_spill]] %s1404_s14  ;;  %s1961_s20 = smov (!%p40_p0, %s42_s20), %s1404_s14 }
  0x1f   : > { %1898 = sst [smem:[#allocation24_spill]] %s1408_s15  ;;  %p44_p2 = scmp.ge.s32.totalorder %s1961_s20, 2 }
  0x20   : > { %1899 = sst [smem:[#allocation25_spill]] %s1959_s19  ;;  %p175_p3 = scmp.ne.s32.totalorder %s1384_s9, %s1380_s8 }
  0x21   : > { %s157_s23 = scalar_select %p156_p1, %s1400_s13, 0 }
  0x22   : > { %p1556_p4 = scmp.eq.s32.totalorder %s1856_s17, 7  ;;  %p181_p5 = scmp.ne.s32.totalorder %s1380_s8, %s1376_s30 }
  0x23   : > { %s1963_s20 = smov (%p44_p2, %s1961_s20), 0  ;;  %s1965_s21 = smov (!%p44_p2, %s46_s21), %s1408_s15 }
  0x24   : > { %1901 = sst [smem:[#allocation26_spill]] %s1963_s20  ;;  %p158_p6 = scmp.eq.s32.totalorder %s1963_s20, 1 }
  0x25   : > { %p1568_p7 = por %p1556_p4, %p175_p3  ;;  %p48_p8 = scmp.ge.s32.totalorder %s1965_s21, 2 }
  0x26   : > { %s1904_s17 = sadd.s32 4294967294, %s1412_s16   ;;  %s191_s5 = sadd.s32 1, %s1372_s29 }
  0x27   : > { %s1902_s18 = scalar_select %p1568_p7, 1, 0 }
  0x28   : > { %p1574_p9 = scmp.eq.s32.totalorder %s1904_s17, 7  ;;  %s1967_s21 = smov (%p48_p8, %s1965_s21), 0 }
  0x29   : > { %1903 = sst [smem:[#allocation27_spill]] %s1902_s18  ;;  %s160_s17 = ssub.s32 %s1408_s15, %s1967_s21 }
  0x2a   : > { %s159_s4 = scalar_select %p158_p6, %s1959_s19, 0 }
  0x2b   : > { %1906 = sst [smem:[#allocation28_spill]] %s1967_s21  ;;  %p1583_p10 = por %p1574_p9, %p181_p5 }
  0x2c   : > { %s161_s6 = ssub.s32 %s157_s23, %s159_s4  ;;  %p189_p11 = scmp.eq.s32.totalorder %s160_s17, 0 }
  0x2d   : > { %s1907_s18 = scalar_select %p1583_p10, 1, 0 }
  0x2e   : > { %s162_s3 = sor.u32 %s161_s6, %s160_s17  ;;  %p201_p13 = scmp.ne.s32.totalorder %s1372_s29, %s1368_s28 }
  0x2f   : > { %1908 = sst [smem:[#allocation29_spill]] %s1907_s18  ;;  %p163_p12 = scmp.eq.s32.totalorder %s162_s3, 0 }
  0x30   : > { %s1593_s4 = scalar_select %p189_p11, %s1372_s29, %s191_s5  }
  0x31   : > { %s1596_s23 = scalar_select %p163_p12, %s1384_s9, %s165_s22  }
  0x32   : > { %1909 = sst [smem:[#allocation30_spill]] %s1593_s4  ;;  %p1600_p0 = por %p201_p13, %p1556_p4 }
  0x33   : > { %1910 = sst [smem:[#allocation31_spill]] %s1596_s23  ;;  %p207_p1 = scmp.ne.s32.totalorder %s1368_s28, %s1364_s27 }
  0x34   : > { %p214_p2 = scmp.eq.s32.totalorder %s1404_s14, 0  ;;  %p216_p3 = scmp.eq.s32.totalorder %s1963_s20, 0 }
  0x35   : > { %p1610_p5 = por %p207_p1, %p1574_p9  ;;  %s223_s5 = sadd.s32 1, %s1360_s26 }
  0x36   : > { %s215_s6 = scalar_select %p214_p2, %s1400_s13, 1 }
  0x37   : > { %s1912_s3 = scalar_select %p1610_p5, 1, 0 }
  0x38   : > { %s217_s22 = scalar_select %p216_p3, %s1959_s19, 1 }
  0x39   : > { %1913 = sst [smem:[#allocation32_spill]] %s1912_s3  ;;  %p233_p6 = scmp.ne.s32.totalorder %s1360_s26, %s1356_s25 }
  0x3a   : > { %p239_p8 = scmp.ne.s32.totalorder %s1356_s25, %s1352_s24  ;;  %s219_s21 = ssub.s32 %s215_s6, %s217_s22 }
  0x3b   : > { %p954_p11 = scmp.ge.s32.totalorder %s1412_s16, 1  ;;  %s220_s15 = sor.u32 %s219_s21, %s160_s17 }
  0x3c   : > { %p1624_p12 = por %p233_p6, %p1556_p4  ;;  %p221_p13 = scmp.eq.s32.totalorder %s220_s15, 0 }
  0x3d   : > { %p1630_p10 = por %p239_p8, %p1574_p9  ;;  %p319_p1 = scmp.lt.s32.totalorder %s1412_s16, 9 }
  0x3e   : > { %s1636_s14 = scalar_select %p221_p13, %s1360_s26, %s223_s5  }
  0x3f   : > { %s1915_s20 = scalar_select %p1630_p10, 1, 0 }
  0x40   : > { %1917 = sst [smem:[#allocation34_spill]] %s1636_s14  ;;  %p320_p2 = pnand %p954_p11, %p319_p1 }
  0x41   : > { %1916 = sst [smem:[#allocation33_spill]] %s1915_s20  ;;  %s1640_s24 = sand.u32 (!%p320_p2), 1, %s1368_s28  }
  0x42   : > { %323 = sbr.rel (%p320_p2) target bundleno = 928 (0x3a0), region = 36  ;;  %s368_s30 = sand.u32 (!%p320_p2), 1, %s1356_s25  }
  0x43   : > { %s955_s15 = sshll.u32 (!%p320_p2), %s1640_s24, 4  ;;  %p377_p4 = scmp.eq.s32.totalorder (!%p320_p2), %s1392_s11, 0 }
  0x44   : > { %p379_p9 = scmp.lt.s32.totalorder (!%p320_p2), %s1396_s12, 1  ;;  %s1918_s1 = sld [smem:[#allocation36_spill]] (!%p320_p2) }
  0x45   : > { %s1919_s0 = sld [smem:[#allocation35_spill]] (!%p320_p2)  ;;  %s1920_s14 = sand.u32 (!%p320_p2), 1, %s1380_s8  }
  0x46   : > { %s1662_s26 = scalar_lea.vmem (!%p320_p2), [#allocation4], %s1920_s14  ;;  %s363_s25 = scalar_lea.vmem (!%p320_p2), [#allocation6], %s1640_s24 }
  0x47   : > { %s1647_s21 = scalar_select %p377_p4, %s1388_s10, 1 }
  0x48   : > { %s380_s17 = scalar_select %p379_p9, %s1396_s12, 1 }
  0x49   : > { %p381_p3 = scmp.lt.s32.totalorder %s1647_s21, 1  ;;  %s1665_s27 = scalar_lea.vmem [#allocation8], %s368_s30 }
  0x4a   : > { %s956_s5 = sshll.u32 %s380_s17, 1  ;;  %s1667_s20 = scalar_lea.vmem [#allocation9], %s955_s15 }
  0x4b   : > { %s382_s6 = scalar_select %p381_p3, %s1647_s21, 1 }
  0x4c   : > { %p959_p6 = scmp.ne.s32.totalorder %s1392_s11, 0 }
  0x4d   : > { %s384_s22 = sadd.s32 %s956_s5, %s382_s6  ;;  %p960_p8 = scmp.ne.s32.totalorder (!%p959_p6), %s1388_s10, 0 }
  0x4e   : > { %s957_s19 = sshll.u32 %s384_s22, 2  ;;  %s1655_s9 = scalar_lea.vmem %s1918_s1, %s384_s22 }
  0x4f   : > { %s386_s28 = scalar_lea.vmem %s1919_s0, %s957_s19  ;;  %407 = sbr.rel (%p959_p6) target bundleno = 368 (0x170), region = 40 }
  0x54   : > { %411 = sbr.rel (%p960_p8) target bundleno = 92 (0x5c), region = 44 }
  0x59   : > { %vm412_vm0 = vcmask 130048   ;;  %vm414_vm1 = vcmask 122880   ;;  %v1414_v0 = vmov 0.0  }
  0x5a   : > { %413 = vst.msk [vmem:[#allocation2] sm:$0xff] %vm412_vm0, %v1414_v0 }
  0x5b   : > { %415 = vst.msk [vmem:[#allocation2 + $0x8] sm:$0x1] %vm414_vm1, %v1414_v0 }
  0x5c PF: > { %v419_v1 = vld [vmem:[%s386_s28] sm:$0xf]  ;;  %vm441_vm2 = vcmask 1043456   ;;  %s1921_s2 = sld [smem:[#allocation37_spill]]  ;;  %vm434_vm3 = vcmask 31744   ;;  %v1415_v5 = vmov 0   ;;  %v488_v7 = vlaneseq }
  0x5d   : > { %961 = vmatpush.msk.msra.mxu0 %vm441_vm2, %v419_v1  ;;  %985 = vmatpush.msk.msra.mxu3 %vm441_vm2, %v419_v1  ;;  %s1922_s30 = sld [smem:[#allocation38_spill]]  ;;  %v1147_v10 = vld [vmem:[%s1655_s9] ss:$0 sm:$0xff]  ;;  %v1416_v11 = vmov 1.0   ;;  %s417_s5 = scalar_lea.vmem [#allocation3], %s1388_s10  ;;  %vm525_vm10 = vcmask 130048  }
  0x5e   : > { %1146 = vset.pattern.permute.xlu0 %v1415_v5  ;;  %v489_v8 = vshrl.u32 %v488_v7, 7  ;;  %v416_v14 = vld [vmem:[%s1655_s9] sm:$0x1]  ;;  %vm527_vm11 = vcmask 122880  }
  0x5f   : > { %418 = vst [vmem:[%s417_s5] sm:$0x1] %v416_v14 }
  0x60   : > { %v490_v9 = vadd.s32 8, %v489_v8  ;;  %vm492_vm5 = vcmp.eq.s32.totalorder %v1147_v10, %v489_v8 }
  0x61   : > { %v498_v32 = vld [vmem:[#allocation2] sm:$0xff] }
  0x62   : > { %v420_v2 = vld [vmem:[%s1921_s2] sm:$0xff]  ;;  %v421_v3 = vld [vmem:[%s1921_s2 + $0x8] sm:$0x1]  ;;  %vm493_vm4 = vcmp.eq.s32.totalorder %v1147_v10, %v490_v9 }
  0x63   : > { %s1923_s17 = smov %s1922_s30  ;;  %v423_v4 = vld [vmem:[%s1922_s30 + $0x8] sm:$0x1]  ;;  %962 = vmatmul.msk.f32.vlgmr.msra.gmra.mxu0 %vm434_vm3, %v420_v2  ;;  %963 = vmatmul.msk.f32.vlgmr.msra.gmra.mxu3 %vm434_vm3, %v421_v3 }
  0x64   : > { %431 = vperm.xlu0 %1146, %v423_v4   ;;  %v422_v6 = vld [vmem:[%s1923_s17] sm:$0xff]  ;;  %967 = vmatpush.xpose.msk.msra.mxu1 %vm493_vm4, %v1416_v11  ;;  %v499_v35 = vld [vmem:[#allocation2 + $0x8] sm:$0x1] }
  0x65   : > { %986 = vmatpush.xpose.msk.msra.mxu2 %vm493_vm4, %v1416_v11 }
  0x68   : > { %968 = vmatpush.xpose.msk.msra.mxu1 %vm492_vm5, %v1416_v11 }
  0x69   : > { %987 = vmatpush.xpose.msk.msra.mxu2 %vm492_vm5, %v1416_v11 }
  0x6c   : > { %426 = vperm.xlu0 %1146, %v422_v6  }
  0xd6   : > { %v432_v12 = vpop.permute.xlu0 %431 }
  0xde   : > { %v427_v13 = vpop.permute.xlu0 %426 }
  0xe0   : > { %v462_v15 = vpop.f32.mrf.mxu0 }
  0xe1   : > { %v463_v16 = vadd.f32 %v462_v15, %v427_v13 }
  0xe3   : > { %v964_v17 = vmul.f32 -1.442695, %v463_v16  ;;  %516 = vmatmul.f32.vlgmr.msra.gmra.mxu1 %v463_v16 }
  0xe5   : > { %1148 = vpow2.f32 %v964_v17 }
  0xe6   : > { %v465_v18 = vpop.f32.mrf.mxu3 }
  0xe7   : > { %v466_v19 = vadd.f32 %v465_v18, %v432_v12 }
  0xe9   : > { %519 = vmatmul.f32.vlgmr.msra.gmra.mxu2 %v466_v19 }
  0xeb   : > { %v1149_v20 = vpop.eup %1148 }
  0xec   : > { %v471_v21 = vadd.f32 1.0, %v1149_v20 }
  0xee   : > { %1150 = vrcp.f32 %v471_v21  ;;  %v483_v25 = vand.u32 2147483648, %v471_v21  ;;  %v481_v27 = vand.u32 2147483647, %v471_v21  ;;  %vm477_vm7 = vweird.f32 %v471_v21 }
  0xf0   : > { %v484_v29 = vor.u32 1.1754944e-38, %v483_v25  ;;  %vm482_vm9 = vcmp.eq.f32.partialorder %v481_v27, 8.507059e+37 }
  0xf4   : > { %v1151_v22 = vpop.eup %1150 }
  0xf5   : > { %v473_v23 = vmul.f32 %v1151_v22, %v471_v21  ;;  %vm478_vm6 = vweird.f32 %v1151_v22 }
  0xf6   : > { %vm479_vm8 = vmor %vm477_vm7, %vm478_vm6 }
  0xf7   : > { %v474_v24 = vsub.f32 1.0, %v473_v23 }
  0xf9   : > { %v475_v26 = vmul.f32 %v1151_v22, %v474_v24 }
  0xfb   : > { %v476_v28 = vadd.f32 %v1151_v22, %v475_v26 }
  0xfd   : > { %v480_v30 = vsel %vm479_vm8, %v1151_v22, %v476_v28 }
  0xfe   : > { %v485_v31 = vsel %vm482_vm9, %v484_v29, %v480_v30 }
  0xff   : > { %487 = vst [vmem:[%s1665_s27] sm:$0x1] %v485_v31 }
 0x160   : > { %v517_v33 = vpop.f32.mrf.mxu1 }
 0x161   : > { %v523_v34 = vadd.f32 %v517_v33, %v498_v32 }
 0x163   : > { %526 = vst.msk [vmem:[#allocation2] sm:$0xff] %vm525_vm10, %v523_v34 }
 0x16c   : > { %v520_v36 = vpop.f32.mrf.mxu2 }
 0x16d   : > { %v524_v37 = vadd.f32 %v520_v36, %v499_v35 }
 0x16f   : > { %528 = vst.msk [vmem:[#allocation2 + $0x8] sm:$0x1] %vm527_vm11, %v524_v37 }
 0x170 PF: > { %p969_p11 = scmp.ne.s32.totalorder %s1392_s11, 1 }
 0x171   : > { %p970_p13 = scmp.ne.s32.totalorder (!%p969_p11), %s1388_s10, 0 }
 0x172   : > { %532 = sbr.rel (%p969_p11) target bundleno = 851 (0x353), region = 48 }
 0x177   : > { %v534_v38 = vld [vmem:[#allocation2 + $0x8] sm:$0x1]  ;;  %v533_v49 = vld [vmem:[#allocation2] sm:$0xff] }
 0x178   : > { %v535_v39 = vmax.f32 %v534_v38, 1.0 }
 0x17a   : > { %v536_v40 = vperm.slane %v535_v39, 0 }
 0x17c   : > { %1152 = vrcp.f32 %v536_v40  ;;  %v548_v43 = vand.u32 2147483648, %v536_v40  ;;  %vm542_vm12 = vweird.f32 %v536_v40  ;;  %v546_v45 = vand.u32 2147483647, %v536_v40 }
 0x17e   : > { %v549_v47 = vor.u32 1.1754944e-38, %v548_v43  ;;  %vm547_vm15 = vcmp.eq.f32.partialorder %v546_v45, 8.507059e+37 }
 0x182   : > { %v1153_v41 = vpop.eup %1152 }
 0x183   : > { %v538_v42 = vmul.f32 %v1153_v41, %v536_v40  ;;  %vm543_vm13 = vweird.f32 %v1153_v41 }
 0x184   : > { %vm544_vm14 = vmor %vm542_vm12, %vm543_vm13 }
 0x185   : > { %v539_v44 = vsub.f32 1.0, %v538_v42 }
 0x187   : > { %v540_v46 = vmul.f32 %v1153_v41, %v539_v44 }
 0x189   : > { %v541_v48 = vadd.f32 %v1153_v41, %v540_v46  ;;  %555 = sbr.rel (%p970_p13) target bundleno = 703 (0x2bf), region = 52 }
 0x18b   : > { %v545_v50 = vsel %vm544_vm14, %v1153_v41, %v541_v48 }
 0x18c   : > { %v550_v51 = vsel %vm547_vm15, %v549_v47, %v545_v50 }
 0x18d   : > { %v551_v52 = vmul.f32 %v550_v51, %v533_v49 }
 0x18e   : > { %vm632_vm0 = vcmask 1046528   ;;  %vm575_vm5 = vcmask 122880   ;;  %vm625_vm6 = vcmask 56320   ;;  %v577_v5 = vlaneseq }
 0x18f   : > { %v591_v53 = vrot.slane %v551_v52, 1  ;;  %v971_v54 = vmul.f32 -1.442695, %v551_v52  ;;  %v1417_v8 = vmov 0.0   ;;  %vm658_vm9 = vcmask 130048  }
 0x190   : > { %v578_v6 = vshrl.u32 %v577_v5, 7  ;;  %v581_v7 = vand.u32 127, %v577_v5 }
 0x191   : > { %593 = vxpose.xlu0.b32.start.end [1/1] (short) (narrow) %v591_v53, 16  ;;  %974 = vmatpush.msk.msra.mxu0 %vm632_vm0, %v591_v53  ;;  %1154 = vpow2.f32 %v971_v54 }
 0x192   : > { %988 = vmatpush.msk.msra.mxu1 %vm632_vm0, %v591_v53  ;;  %vm582_vm7 = vcmp.eq.s32.totalorder %v578_v6, %v581_v7  ;;  %v579_v10 = vadd.s32 8, %v578_v6 }
 0x193   : > { %v972_v9 = vsel %vm582_vm7, 1.0, %v1417_v8 }
 0x194   : > { %v588_v11 = vmul.f32 1e-06, %v972_v9  ;;  %vm583_vm8 = vcmp.eq.s32.totalorder %v579_v10, %v581_v7 }
 0x195   : > { %v973_v14 = vsel %vm583_vm8, 1.0, %v1417_v8 }
 0x196   : > { %v589_v15 = vmul.f32 1e-06, %v973_v14 }
 0x197   : > { %v1155_v55 = vpop.eup %1154 }
 0x198   : > { %v559_v56 = vadd.f32 1.0, %v1155_v55 }
 0x19a   : > { %1156 = vrcp.f32 %v559_v56  ;;  %v571_v59 = vand.u32 2147483648, %v559_v56  ;;  %vm565_vm1 = vweird.f32 %v559_v56  ;;  %v569_v61 = vand.u32 2147483647, %v559_v56 }
 0x19c   : > { %v572_v63 = vor.u32 1.1754944e-38, %v571_v59  ;;  %vm570_vm4 = vcmp.eq.f32.partialorder %v569_v61, 8.507059e+37 }
 0x1a0   : > { %v1157_v57 = vpop.eup %1156 }
 0x1a1   : > { %v561_v58 = vmul.f32 %v1157_v57, %v559_v56  ;;  %vm566_vm2 = vweird.f32 %v1157_v57 }
 0x1a2   : > { %vm567_vm3 = vmor %vm565_vm1, %vm566_vm2 }
 0x1a3   : > { %v562_v60 = vsub.f32 1.0, %v561_v58 }
 0x1a5   : > { %v563_v62 = vmul.f32 %v1157_v57, %v562_v60 }
 0x1a7   : > { %v564_v0 = vadd.f32 %v1157_v57, %v563_v62 }
 0x1a9   : > { %v568_v1 = vsel %vm567_vm3, %v1157_v57, %v564_v0 }
 0x1aa   : > { %v573_v2 = vsel %vm570_vm4, %v572_v63, %v568_v1 }
 0x1ab   : > { %576 = vst.msk [vmem:[%s363_s25] sm:$0x1] %vm575_vm5, %v573_v2 }
 0x235   : > { %v609_v3 = vpop.trf.xlu0 }
 0x236   : > { %975 = vmatmul.msk.f32.vlgmr.msra.gmra.mxu0 %vm625_vm6, %v609_v3 }
 0x23d   : > { %v610_v4 = vpop.trf.xlu0 }
 0x23e   : > { %976 = vmatmul.msk.f32.vlgmr.msra.gmra.mxu1 %vm625_vm6, %v610_v4 }
 0x2b3   : > { %v652_v12 = vpop.f32.mrf.mxu0 }
 0x2b4   : > { %v653_v13 = vadd.f32 %v652_v12, %v588_v11 }
 0x2b6   : > { %659 = vst.msk [vmem:[%s1667_s20] sm:$0xff] %vm658_vm9, %v653_v13 }
 0x2bb   : > { %v655_v16 = vpop.f32.mrf.mxu1 }
 0x2bc   : > { %v656_v17 = vadd.f32 %v655_v16, %v589_v15 }
 0x2be   : > { %660 = vst.msk [vmem:[%s1667_s20 + $0x8] sm:$0xff] %vm658_vm9, %v656_v17 }
 0x2bf PF: > { %vm661_vm10 = vcmp.gt.f32.partialorder %v551_v52, 0.0  ;;  %v663_v18 = vlaneseq  ;;  %v1418_v20 = vmov 0   ;;  %vm669_vm11 = vcmask 122880   ;;  %s667_s9 = scalar_lea.vmem [#allocation3], %s1388_s10 }
 0x2c0   : > { %v662_v21 = vsel %vm661_vm10, 1, %v1418_v20  ;;  %v668_v31 = vld [vmem:[%s667_s9] sm:$0x1] }
 0x2c1   : > { %v664_v19 = vand.u32 127, %v663_v18  ;;  %v683_v34 = vand.u32 31, %v668_v31 }
 0x2c3   : > { %v665_v22 = vand.u32 31, %v664_v19 }
 0x2c5   : > { %v666_v23 = vshll.u32 %v662_v21, %v665_v22 }
 0x2c7   : > { %v670_v24 = vsel %vm669_vm11, %v666_v23, 0 }
 0x2c8   : > { %v672_v25 = vshrl.u32 %v670_v24, 16  ;;  %v671_v27 = vand.u32 65535, %v670_v24 }
 0x2ca   : > { %v674_v26 = vcvt.s32.f32 %v672_v25  ;;  %v673_v28 = vcvt.s32.f32 %v671_v27 }
 0x2cc   : > { %677 = vadd.xlane.f32.xlu0 %v674_v26 }
 0x2d4   : > { %675 = vadd.xlane.f32.xlu0 %v673_v28 }
 0x33f   : > { %v678_v29 = vpop.xlane.xlu0 %677 }
 0x340   : > { %v680_v30 = vcvt.f32.s32 %v678_v29 }
 0x342   : > { %v681_v33 = vshll.u32 %v680_v30, 16 }
 0x347   : > { %v676_v32 = vpop.xlane.xlu0 %675 }
 0x348   : > { %v679_v35 = vcvt.f32.s32 %v676_v32 }
 0x34a   : > { %v682_v36 = vadd.s32 %v681_v33, %v679_v35 }
 0x34c   : > { %v684_v37 = vshrl.u32 %v682_v36, %v683_v34 }
 0x34e   : > { %v685_v38 = vand.u32 1, %v684_v37 }
 0x350   : > { %v686_v39 = vcvt.s32.f32 %v685_v38 }
 0x352   : > { %687 = vst [vmem:[%s1662_s26] sm:$0x1] %v686_v39 }
 0x353 PF: > { %s1924_s6 = sadd.s32 4294967295, %s1412_s16   ;;  %s1925_s14 = sld [smem:[#allocation40_spill]] }
 0x354   : > { %s1697_s22 = sand.u32 1, %s1924_s6   ;;  %s729_s7 = sshll.u32 %s363_s25, 4  ;;  %s730_s7 = int_to_ptr.vmem [resolvable:$true] %s729_s7 }
 0x355   : > { %s693_s28 = scalar_lea.sflag [#allocation7], %s1697_s22 }
 0x359   : > { %s1926_s19 = smov %s1925_s14  ;;  %s727_s4 = scalar_lea.hbm %s1925_s14, %s1396_s12 }
 0x35a   : > { %s731_s30 = sshll.u32 %s727_s4, 4  ;;  %s1178_s0 = scalar_lea.hbm %s1926_s19, 2  ;;  %s732_s30 = int_to_ptr.hbm [resolvable:$true] %s731_s30 }
 0x35b   : > { %s1172_s15 = sshra.s32 %s732_s30, 4  ;;  %s1173_s15 = int_to_ptr.hbm [resolvable:$true] %s1172_s15 }
 0x35c   : > { %s1174_s5 = scalar_lea.hbm %s1173_s15, 1  ;;  %p1179_p9 = scmp.lt.s32.totalorder %s1173_s15, %s1926_s19 }
 0x35d   : > { %p1175_p1 = scmp.ne.s32.totalorder %s1173_s15, %s1174_s5  ;;  %p1180_p3 = scmp.lt.s32.totalorder %s1178_s0, %s1174_s5 }
 0x35f   : > { %p1176_p2 = pnand %p1175_p1, %p1600_p0  ;;  %p1181_p6 = por %p1180_p3, %p1179_p9 }
 0x361   : > { %p1177_p4 = pneg %p1176_p2 }
 0x363   : > { %p1182_p8 = pnand %p1181_p6, %p1177_p4 }
 0x365   : > { %1185 = shalt.err (!%p1182_p8)
}
 0x366   : > { %990 = dma.vmem_to_hbm [thread:$0]  (%p1600_p0), %s730_s7, 16, %s732_s30, %s693_s28  }
 0x367   : > { %p708_p11 = scmp.eq.s32.totalorder %s1392_s11, 1  ;;  %s978_s25 = sshll.u32 %s1396_s12, 1 }
 0x368   : > { %s716_s14 = sshll.u32 %s1662_s26, 4  ;;  %s743_s4 = sadd.s32 %s978_s25, %s1647_s21  ;;  %s717_s14 = int_to_ptr.vmem [resolvable:$true] %s716_s14 }
 0x369   : > { %s1969_s10 = smov (!%p708_p11, %s1388_s10), 0  ;;  %s1928_s9 = sld [smem:[#allocation41_spill]] }
 0x36a   : > { %s713_s13 = sadd.s32 %s978_s25, %s1969_s10  ;;  %s746_s1 = sshll.u32 %s1665_s27, 4  ;;  %s1730_s1 = int_to_ptr.vmem [resolvable:$true] %s746_s1 }
 0x36b   : > { %s1930_s19 = sld [smem:[#allocation39_spill]]  ;;  %s1931_s26 = sand.u32 1, %s1380_s8  }
 0x36c   : > { %s689_s21 = scalar_lea.sflag [#allocation5], %s1931_s26 }
 0x36f   : > { %s1929_s6 = smov %s1928_s9  ;;  %s744_s29 = scalar_lea.hbm %s1928_s9, %s743_s4 }
 0x370   : > { %s1732_s11 = sshll.u32 %s744_s29, 4  ;;  %s749_s11 = int_to_ptr.hbm [resolvable:$true] %s1732_s11 }
 0x371   : > { %s714_s3 = scalar_lea.hbm %s1930_s19, %s713_s13  ;;  %s1206_s10 = scalar_lea.hbm %s1930_s19, 4 }
 0x372   : > { %s718_s7 = sshll.u32 %s714_s3, 4  ;;  %s719_s7 = int_to_ptr.hbm [resolvable:$true] %s718_s7 }
 0x373   : > { %s1200_s30 = sshra.s32 %s719_s7, 4  ;;  %s1201_s30 = int_to_ptr.hbm [resolvable:$true] %s1200_s30 }
 0x374   : > { %s1202_s15 = scalar_lea.hbm %s1201_s30, 1  ;;  %p1207_p4 = scmp.lt.s32.totalorder %s1201_s30, %s1930_s19 }
 0x375   : > { %p1203_p13 = scmp.ne.s32.totalorder %s1201_s30, %s1202_s15  ;;  %p1208_p9 = scmp.lt.s32.totalorder %s1206_s10, %s1202_s15 }
 0x377   : > { %p1204_p1 = pnand %p1203_p13, %p1568_p7  ;;  %p1209_p3 = por %p1208_p9, %p1207_p4 }
 0x379   : > { %p1205_p2 = pneg %p1204_p1 }
 0x37b   : > { %p1210_p6 = pnand %p1209_p3, %p1205_p2 }
 0x37d   : > { %1213 = shalt.err (!%p1210_p6)
}
 0x37e   : > { %989 = dma.vmem_to_hbm [thread:$0]  (%p1568_p7), %s717_s14, 16, %s719_s7, %s689_s21  }
 0x37f   : > { %s1228_s25 = sshra.s32 %s749_s11, 4  ;;  %s1234_s29 = scalar_lea.hbm %s1929_s6, 4  ;;  %s1229_s25 = int_to_ptr.hbm [resolvable:$true] %s1228_s25 }
 0x380   : > { %s1230_s4 = scalar_lea.hbm %s1229_s25, 1  ;;  %p1235_p1 = scmp.lt.s32.totalorder %s1229_s25, %s1929_s6 }
 0x381   : > { %p1231_p8 = scmp.ne.s32.totalorder %s1229_s25, %s1230_s4  ;;  %p1236_p2 = scmp.lt.s32.totalorder %s1234_s29, %s1230_s4 }
 0x383   : > { %p1232_p11 = pnand %p1231_p8, %p1624_p12  ;;  %p1237_p4 = por %p1236_p2, %p1235_p1 }
 0x385   : > { %p1233_p13 = pneg %p1232_p11 }
 0x387   : > { %p1238_p9 = pnand %p1237_p4, %p1233_p13 }
 0x389   : > { %1241 = shalt.err (!%p1238_p9)
}
 0x38a   : > { %991 = dma.vmem_to_hbm [thread:$0]  (%p1624_p12), %s1730_s1, 16, %s749_s11, %s693_s28  }
 0x38b   : > { %s984_s14 = sshll.u32 %s1396_s12, 4  ;;  %s1932_s21 = sld [smem:[#allocation42_spill]] }
 0x38c   : > { %s760_s15 = sshll.u32 %s1667_s20, 4  ;;  %s701_s2 = scalar_lea.sflag [#allocation10], %s1640_s24  ;;  %s761_s15 = int_to_ptr.vmem [resolvable:$true] %s760_s15 }
 0x391   : > { %s759_s30 = scalar_lea.hbm %s1932_s21, %s984_s14  ;;  %s1262_s1 = scalar_lea.hbm %s1932_s21, 32 }
 0x392   : > { %s762_s27 = sshll.u32 %s759_s30, 4  ;;  %s763_s27 = int_to_ptr.hbm [resolvable:$true] %s762_s27 }
 0x393   : > { %s1256_s10 = sshra.s32 %s763_s27, 4  ;;  %s1257_s10 = int_to_ptr.hbm [resolvable:$true] %s1256_s10 }
 0x394   : > { %s1258_s23 = scalar_lea.hbm %s1257_s10, 16  ;;  %p1263_p12 = scmp.lt.s32.totalorder %s1257_s10, %s1932_s21 }
 0x395   : > { %p1259_p7 = scmp.ne.s32.totalorder %s1257_s10, %s1258_s23  ;;  %p1264_p8 = scmp.lt.s32.totalorder %s1262_s1, %s1258_s23 }
 0x397   : > { %p1260_p3 = pnand %p1259_p7, %p1600_p0  ;;  %p1265_p11 = por %p1264_p8, %p1263_p12 }
 0x399   : > { %p1261_p6 = pneg %p1260_p3 }
 0x39b   : > { %p1266_p13 = pnand %p1265_p11, %p1261_p6 }
 0x39d   : > { %1269 = shalt.err (!%p1266_p13)
}
 0x39e   : > { %s1419_s20 = smov 128   ;;  %s1420_s24 = smov 8  }
 0x39f   : > { %992 = dma.vmem_to_hbm [thread:$0]  (%p1600_p0), %s761_s15, 256, %s763_s27, %s701_s2, %s1419_s20, %s1419_s20, %s1420_s24  }
 0x3a0 PF: > { %s1933_s11 = sld [smem:[#allocation20_spill]]  ;;  %p1010_p1 = scmp.ge.s32.totalorder %s1412_s16, 2 }
 0x3a1   : > { %s1934_s3 = sld [smem:[#allocation29_spill]] }
 0x3a6   : > { %s777_s25 = sand.u32 1, %s1933_s11  }
 0x3a7   : > { %p1935_p2 = scmp.ne.s32.totalorder %s1934_s3, 0  ;;  %s778_s4 = scalar_lea.sflag [#allocation5], %s777_s25 }
 0x3a9   : > { %p998_p4 = pnand %p1010_p1, %p1935_p2 }
 0x3ab   : > { %p999_p9 = pneg %p998_p4 }
 0x3ad   : > { %1335 = dma.done.wait (%p999_p9), %s778_s4, 16  }
 0x3ae   : > { %1337 = vsyncadd (%p999_p9), %s778_s4, 4294967280  ;;  %s1936_s5 = sadd.s32 4294967294, %s1412_s16   ;;  %p1001_p0 = pnand %p1010_p1, %p1610_p5 }
 0x3af   : > { %s786_s18 = sand.u32 1, %s1936_s5  }
 0x3b0   : > { %p1002_p7 = pneg %p1001_p0  ;;  %s787_s29 = scalar_lea.sflag [#allocation7], %s786_s18 }
 0x3b2   : > { %1339 = dma.done.wait (%p1002_p7), %s787_s29, 16  }
 0x3b3   : > { %1341 = vsyncadd (%p1002_p7), %s787_s29, 4294967280  ;;  %p1004_p3 = pnand %p1010_p1, %p1630_p10 }
 0x3b5   : > { %p1005_p6 = pneg %p1004_p3 }
 0x3b7   : > { %1343 = dma.done.wait (%p1005_p6), %s787_s29, 16  }
 0x3b8   : > { %1345 = vsyncadd (%p1005_p6), %s787_s29, 4294967280  ;;  %s1939_s26 = sld [smem:[#allocation17_spill]] }
 0x3be   : > { %s804_s14 = sand.u32 1, %s1939_s26  }
 0x3bf   : > { %s805_s0 = scalar_lea.sflag [#allocation10], %s804_s14 }
 0x3c0   : > { %1347 = dma.done.wait (%p1002_p7), %s805_s0, 256  }
 0x3c1   : > { %1349 = vsyncadd (%p1002_p7), %s805_s0, 4294967040  ;;  %s27_s16 = sadd.s32 1, %s1412_s16   ;;  %s1941_s24 = sld [smem:[#allocation15_spill]] }
 0x3c2   : > { %p1794_p5 = scmp.ge.s32.totalorder %s27_s16, 10   ;;  %s1942_s25 = sld [smem:[#allocation16_spill]] }
 0x3c3   : > { %s1943_s26 = sld [smem:[#allocation34_spill]]  ;;  %s1955_s30 = smov %s1380_s8 }
 0x3c4   : > { %s1944_s27 = sld [smem:[#allocation18_spill]] }
 0x3c5   : > { %s1945_s28 = sld [smem:[#allocation19_spill]] }
 0x3c6   : > { %s1946_s29 = sld [smem:[#allocation30_spill]] }
 0x3c7   : > { %s1947_s15 = sld [smem:[#allocation21_spill]] }
 0x3c8   : > { %s1948_s9 = sld [smem:[#allocation31_spill]] }
 0x3c9   : > { %s1949_s10 = sld [smem:[#allocation22_spill]] }
 0x3ca   : > { %s1950_s11 = sld [smem:[#allocation23_spill]] }
 0x3cb   : > { %s1951_s12 = sld [smem:[#allocation24_spill]] }
 0x3cc   : > { %s1952_s13 = sld [smem:[#allocation25_spill]] }
 0x3cd   : > { %s1953_s14 = sld [smem:[#allocation26_spill]]  ;;  %s1956_s8 = smov %s1947_s15 }
 0x3ce   : > { %s1954_s2 = sld [smem:[#allocation28_spill]] }
 0x3d0   :  { %26 = sbr.rel (!%p1794_p5) target bundleno = 22 (0x16), region = 141 }
 0x3d4   : > { %s1957_s15 = smov %s1954_s2 }
 0x3d5   :  { %811 = vsyncpa [#allocation5], 1 }
 0x3d6   :  { %813 = vsyncpa [#allocation5 + $0x1], 1 }
 0x3d7   :  { %814 = vsyncpa [#allocation7], 1 }
 0x3d8   :  { %816 = vsyncpa [#allocation7 + $0x1], 1 }
 0x3d9   :  { %817 = vsyncpa [#allocation10], 1 }
 0x3da   :  { %819 = vsyncpa [#allocation10 + $0x1], 1 }

</bundles_post_ra>
